<compile_context>
chip_gen: v6e
topology: v6e:2x2x1
jax: 0.10.0
libtpu: 0.0.40
codegen_flags: <defaults>
</compile_context>

<pallas_src>
import functools

import numpy as np
import jax
import jax.numpy as jnp
from jax import lax
from jax.experimental import pallas as pl
from jax.experimental.pallas import tpu as pltpu


LANE = 128      # vreg lane width (same on v5e / v6e / v7x)
SUBLANE = 8     # vreg sublane count


def _round_up(n, m):
    return ((n + m - 1) // m) * m


def _num_tensorcores():
    """Best-effort TensorCore count: 2 on v7x, 1 on v5e/v6e (and on any failure)."""
    try:
        kind = (getattr(jax.devices()[0], "device_kind", "") or "").lower()
        if "v7" in kind or "7x" in kind:
            return 2
    except Exception:
        pass
    return 1


# ----------------------------------------------------------------------------
# Pallas kernel: fused MLP chain, feature-major activations (batch on lanes)
# ----------------------------------------------------------------------------
def wavenet_kernel(x_ref, w_ref, b_ref, out_ref, *, n_lin, innodes, F, C8):
    """
    x_ref   : (tb, innodes)    f32  native row-major input tile
    w_ref   : (F, n_lin * F)   bf16 lane-dense packed weights, layer i at lanes [i*F,(i+1)*F)
    b_ref   : (F, n_lin)       f32  packed biases (layer i in lane i)
    out_ref : (C8, tb)         f32  feature-major logits; rows >= num_classes are zero
    """
    tb = x_ref.shape[0]
    x = x_ref[...].astype(jnp.bfloat16)                         # (tb, innodes)
    if innodes < F:
        # Explicit zero-fill of the padded feature columns (weight cols there are zero
        # too, but stale VMEM garbage could be NaN/Inf -> zero it deterministically).
        xf = jnp.concatenate(
            [x, jnp.zeros((tb, F - innodes), jnp.bfloat16)], axis=1)   # (tb, F)
    else:
        xf = x

    # Layer 0:  h = relu(W0 @ x^T + b0)  -> feature-major (F, tb), K = F contraction.
    h = lax.dot_general(w_ref[:, 0:F], xf, (((1,), (1,)), ((), ())),
                        preferred_element_type=jnp.float32)      # (F, tb)
    h = jnp.maximum(h + b_ref[:, 0:1], 0.0)

    # Hidden Linear + ReLU blocks.
    for i in range(1, n_lin - 1):
        w = w_ref[:, i * F:(i + 1) * F]                          # (F, F) bf16
        h = jnp.dot(w, h.astype(jnp.bfloat16),
                    preferred_element_type=jnp.float32)          # (F, tb)
        h = jnp.maximum(h + b_ref[:, i:i + 1], 0.0)

    # Final fc (no activation): only C8 (= round_up(num_classes, 8)) output rows.
    wf = w_ref[:C8, (n_lin - 1) * F:n_lin * F]                   # (C8, F) bf16
    out = jnp.dot(wf, h.astype(jnp.bfloat16),
                  preferred_element_type=jnp.float32)            # (C8, tb)
    out_ref[...] = out + b_ref[:C8, n_lin - 1:n_lin]


# ----------------------------------------------------------------------------
# Wrapper
# ----------------------------------------------------------------------------
def wavenet_forward(x, weights, biases, num_classes, *, tb=2048):
    """WaveNET forward.

    x       : (B, innodes) f32
    weights : list of (out_i, in_i) f32 arrays (PyTorch nn.Linear convention)
    biases  : list of (out_i,) f32 arrays
    returns : (B, num_classes) f32
    """
    B, innodes = x.shape
    n_lin = len(weights)

    # Common padded feature dim; all layer widths zero-padded to F.
    dims = [innodes] + [w.shape[0] for w in weights]
    F = _round_up(max(dims), SUBLANE)
    C8 = _round_up(num_classes, SUBLANE)

    # ---- batch tiling: lane-dense batch axis --------------------------------
    B_lanes = _round_up(B, LANE)
    tb_req = max(LANE, (min(tb, B_lanes) // LANE) * LANE)
    n_steps = pl.cdiv(B_lanes, tb_req)
    n_tc = _num_tensorcores()
    if n_tc > 1 and B_lanes >= n_tc * LANE:
        n_steps = max(n_steps, n_tc)          # megacore split only where it exists (v7x)
    tb_eff = _round_up(pl.cdiv(B_lanes, n_steps), LANE)
    B_pad = tb_eff * n_steps
    grid = (B_pad // tb_eff,)

    # ---- pack parameters: one lane-dense bf16 weight slab + one f32 bias tile
    w_slab = jnp.zeros((F, n_lin * F), jnp.float32)
    b_slab = jnp.zeros((F, n_lin), jnp.float32)
    for i, (W, b) in enumerate(zip(weights, biases)):
        o, ii = W.shape
        w_slab = w_slab.at[:o, i * F:i * F + ii].set(W.astype(jnp.float32))
        b_slab = b_slab.at[:o, i].set(b.astype(jnp.float32))
    w_slab = w_slab.astype(jnp.bfloat16)

    # ---- input stays in native (B, innodes) layout; pad batch only if needed
    if B_pad != B:
        x_in = jnp.zeros((B_pad, innodes), jnp.float32).at[:B].set(
            x.astype(jnp.float32))
    else:
        x_in = x.astype(jnp.float32)

    kernel = functools.partial(wavenet_kernel, n_lin=n_lin, innodes=innodes,
                               F=F, C8=C8)
    out_fm = pl.pallas_call(
        kernel,
        out_shape=jax.ShapeDtypeStruct((C8, B_pad), jnp.float32),
        grid_spec=pltpu.PrefetchScalarGridSpec(
            num_scalar_prefetch=0,
            grid=grid,
            in_specs=[
                pl.BlockSpec((tb_eff, innodes), lambda i: (i, 0)),     # x tile
                pl.BlockSpec((F, n_lin * F), lambda i: (0, 0)),        # weight slab
                pl.BlockSpec((F, n_lin), lambda i: (0, 0)),            # bias slab
            ],
            out_specs=pl.BlockSpec((C8, tb_eff), lambda i: (0, i)),
        ),
        compiler_params=pltpu.CompilerParams(
            dimension_semantics=("parallel",)),
    )(x_in, w_slab, b_slab)

    # Un-pad and return row-major (B, num_classes); this transpose touches only
    # 8 rows x B lanes, negligible vs. the input read.
    return out_fm[:num_classes, :B].T


# ----------------------------------------------------------------------------
# Deterministic parameter construction matching WaveNET.__init__
# ----------------------------------------------------------------------------
def build_wavenet_params(key, planes, nodes, num_classes=3, innodes=5):
    """Returns PyTorch-convention weights (out, in) and biases (out,) per Linear."""
    dims = []
    in_d = innodes
    for p, n in zip(planes, nodes):
        dims.append((in_d, n))
        in_d = n
        for _ in range(1, p):
            dims.append((in_d, n))
    dims.append((in_d, num_classes))  # fin_fc

    weights, biases_ = [], []
    gain = np.sqrt(2.0 / (1.0 + 0.01 ** 2))  # kaiming_normal_, leaky_relu, slope=0.01
    for (fan_in, fan_out) in dims:
        key, kw, kb = jax.random.split(key, 3)
        std = gain / np.sqrt(fan_out)        # mode='fan_out'
        W = std * jax.random.normal(kw, (fan_out, fan_in), jnp.float32)
        bound = 1.0 / np.sqrt(fan_in)        # default nn.Linear bias init
        b = jax.random.uniform(kb, (fan_out,), jnp.float32, -bound, bound)
        weights.append(W)
        biases_.append(b)
    return weights, biases_


def reference_forward(x, weights, biases):
    """Pure-JAX f32 reference (Linear+ReLU blocks, final Linear) at HIGHEST precision."""
    h = x
    for W, b in zip(weights[:-1], biases[:-1]):
        h = jnp.maximum(jnp.dot(h, W.T, precision=lax.Precision.HIGHEST) + b, 0.0)
    return jnp.dot(h, weights[-1].T, precision=lax.Precision.HIGHEST) + biases[-1]


if __name__ == "__main__":
    planes = [2, 2, 2]
    nodes = [16, 32, 16]
    num_classes = 3
    innodes = 5

    key = jax.random.PRNGKey(0)
    kparam, kx1, kx2 = jax.random.split(key, 3)
    weights, biases = build_wavenet_params(kparam, planes, nodes, num_classes, innodes)

    # bf16 MXU inputs (f32 accumulation) -> loosened tolerance vs. the f32 reference.
    RTOL, ATOL = 5e-2, 5e-2

    # small batch (single grid step, padded to one 128-lane tile)
    x = jax.random.normal(kx1, (16, innodes), jnp.float32)
    out = jax.block_until_ready(wavenet_forward(x, weights, biases, num_classes))
    ref = jax.block_until_ready(reference_forward(x, weights, biases))
    np.testing.assert_allclose(np.asarray(out), np.asarray(ref), rtol=RTOL, atol=ATOL)

    # larger batch: exercises the cdiv grid / tile-selection path
    x2 = jax.random.normal(kx2, (384, innodes), jnp.float32)
    out2 = jax.block_until_ready(wavenet_forward(x2, weights, biases, num_classes))
    ref2 = jax.block_until_ready(reference_forward(x2, weights, biases))
    np.testing.assert_allclose(np.asarray(out2), np.asarray(ref2), rtol=RTOL, atol=ATOL)

    print("KERNEL_OK")
</pallas_src>

<mosaic_0001>
module attributes {stable_mosaic.version = 11 : i64} {
  func.func @wavenet_kernel(%arg0: i32, %arg1: memref<128x5xf32, #tpu.memory_space<vmem>>, %arg2: memref<32x224xbf16, #tpu.memory_space<vmem>>, %arg3: memref<32x7xf32, #tpu.memory_space<vmem>>, %arg4: memref<8x128xf32, #tpu.memory_space<vmem>>) attributes {dimension_semantics = [#tpu.dimension_semantics<parallel>], iteration_bounds = array<i64: 1>, scalar_prefetch = 0 : i64, scratch_operands = 0 : i64, tpu.core_type = #tpu.core_type<tc>, window_params = [{transform_indices = @transform_0, window_bounds = array<i64: 128, 5>}, {pipeline_mode = #tpu.pipeline_mode<synchronous>, transform_indices = @transform_1, window_bounds = array<i64: 32, 224>}, {pipeline_mode = #tpu.pipeline_mode<synchronous>, transform_indices = @transform_2, window_bounds = array<i64: 32, 7>}, {transform_indices = @transform_3, window_bounds = array<i64: 8, 128>}]} {
    %c0 = arith.constant 0 : index
    %c0_0 = arith.constant 0 : index
    %0 = vector.load %arg1[%c0, %c0_0] : memref<128x5xf32, #tpu.memory_space<vmem>>, vector<128x5xf32>
    %1 = arith.truncf %0 : vector<128x5xf32> to vector<128x5xbf16>
    %cst = arith.constant 0.000000e+00 : bf16
    %2 = vector.broadcast %cst : bf16 to vector<128x27xbf16>
    %3 = tpu.concatenate %1, %2 in 1 : vector<128x5xbf16>, vector<128x27xbf16> -> vector<128x32xbf16>
    %c0_1 = arith.constant 0 : index
    %c0_2 = arith.constant 0 : index
    %4 = vector.load %arg2[%c0_1, %c0_2] : memref<32x224xbf16, #tpu.memory_space<vmem>>, vector<32x32xbf16>
    %cst_3 = arith.constant dense<0.000000e+00> : vector<32x128xf32>
    %5 = tpu.matmul %4, %3, %cst_3 {dimension_numbers = #tpu.dot_dimension_numbers<[1], [1], [0], [0], [0, 0, 1, 0], [], []>} : vector<32x32xbf16>, vector<128x32xbf16>, vector<32x128xf32> -> vector<32x128xf32>
    %c0_4 = arith.constant 0 : index
    %c0_5 = arith.constant 0 : index
    %6 = vector.load %arg3[%c0_4, %c0_5] : memref<32x7xf32, #tpu.memory_space<vmem>>, vector<32x1xf32>
    %7 = vector.broadcast %6 : vector<32x1xf32> to vector<32x128xf32>
    %8 = arith.addf %5, %7 : vector<32x128xf32>
    %cst_6 = arith.constant 0.000000e+00 : f32
    %9 = vector.broadcast %cst_6 : f32 to vector<32x128xf32>
    %10 = arith.maximumf %8, %9 : vector<32x128xf32>
    %c0_7 = arith.constant 0 : index
    %c32 = arith.constant 32 : index
    %11 = vector.load %arg2[%c0_7, %c32] : memref<32x224xbf16, #tpu.memory_space<vmem>>, vector<32x32xbf16>
    %12 = arith.truncf %10 : vector<32x128xf32> to vector<32x128xbf16>
    %cst_8 = arith.constant dense<0.000000e+00> : vector<32x128xf32>
    %13 = tpu.matmul %11, %12, %cst_8 {dimension_numbers = #tpu.dot_dimension_numbers<[1], [0], [0], [1], [0, 0, 1, 1], [], []>} : vector<32x32xbf16>, vector<32x128xbf16>, vector<32x128xf32> -> vector<32x128xf32>
    %c0_9 = arith.constant 0 : index
    %c1 = arith.constant 1 : index
    %14 = vector.load %arg3[%c0_9, %c1] : memref<32x7xf32, #tpu.memory_space<vmem>>, vector<32x1xf32>
    %15 = vector.broadcast %14 : vector<32x1xf32> to vector<32x128xf32>
    %16 = arith.addf %13, %15 : vector<32x128xf32>
    %cst_10 = arith.constant 0.000000e+00 : f32
    %17 = vector.broadcast %cst_10 : f32 to vector<32x128xf32>
    %18 = arith.maximumf %16, %17 : vector<32x128xf32>
    %c0_11 = arith.constant 0 : index
    %c64 = arith.constant 64 : index
    %19 = vector.load %arg2[%c0_11, %c64] : memref<32x224xbf16, #tpu.memory_space<vmem>>, vector<32x32xbf16>
    %20 = arith.truncf %18 : vector<32x128xf32> to vector<32x128xbf16>
    %cst_12 = arith.constant dense<0.000000e+00> : vector<32x128xf32>
    %21 = tpu.matmul %19, %20, %cst_12 {dimension_numbers = #tpu.dot_dimension_numbers<[1], [0], [0], [1], [0, 0, 1, 1], [], []>} : vector<32x32xbf16>, vector<32x128xbf16>, vector<32x128xf32> -> vector<32x128xf32>
    %c0_13 = arith.constant 0 : index
    %c2 = arith.constant 2 : index
    %22 = vector.load %arg3[%c0_13, %c2] : memref<32x7xf32, #tpu.memory_space<vmem>>, vector<32x1xf32>
    %23 = vector.broadcast %22 : vector<32x1xf32> to vector<32x128xf32>
    %24 = arith.addf %21, %23 : vector<32x128xf32>
    %cst_14 = arith.constant 0.000000e+00 : f32
    %25 = vector.broadcast %cst_14 : f32 to vector<32x128xf32>
    %26 = arith.maximumf %24, %25 : vector<32x128xf32>
    %c0_15 = arith.constant 0 : index
    %c96 = arith.constant 96 : index
    %27 = vector.load %arg2[%c0_15, %c96] : memref<32x224xbf16, #tpu.memory_space<vmem>>, vector<32x32xbf16>
    %28 = arith.truncf %26 : vector<32x128xf32> to vector<32x128xbf16>
    %cst_16 = arith.constant dense<0.000000e+00> : vector<32x128xf32>
    %29 = tpu.matmul %27, %28, %cst_16 {dimension_numbers = #tpu.dot_dimension_numbers<[1], [0], [0], [1], [0, 0, 1, 1], [], []>} : vector<32x32xbf16>, vector<32x128xbf16>, vector<32x128xf32> -> vector<32x128xf32>
    %c0_17 = arith.constant 0 : index
    %c3 = arith.constant 3 : index
    %30 = vector.load %arg3[%c0_17, %c3] : memref<32x7xf32, #tpu.memory_space<vmem>>, vector<32x1xf32>
    %31 = vector.broadcast %30 : vector<32x1xf32> to vector<32x128xf32>
    %32 = arith.addf %29, %31 : vector<32x128xf32>
    %cst_18 = arith.constant 0.000000e+00 : f32
    %33 = vector.broadcast %cst_18 : f32 to vector<32x128xf32>
    %34 = arith.maximumf %32, %33 : vector<32x128xf32>
    %c0_19 = arith.constant 0 : index
    %c128 = arith.constant 128 : index
    %35 = vector.load %arg2[%c0_19, %c128] : memref<32x224xbf16, #tpu.memory_space<vmem>>, vector<32x32xbf16>
    %36 = arith.truncf %34 : vector<32x128xf32> to vector<32x128xbf16>
    %cst_20 = arith.constant dense<0.000000e+00> : vector<32x128xf32>
    %37 = tpu.matmul %35, %36, %cst_20 {dimension_numbers = #tpu.dot_dimension_numbers<[1], [0], [0], [1], [0, 0, 1, 1], [], []>} : vector<32x32xbf16>, vector<32x128xbf16>, vector<32x128xf32> -> vector<32x128xf32>
    %c0_21 = arith.constant 0 : index
    %c4 = arith.constant 4 : index
    %38 = vector.load %arg3[%c0_21, %c4] : memref<32x7xf32, #tpu.memory_space<vmem>>, vector<32x1xf32>
    %39 = vector.broadcast %38 : vector<32x1xf32> to vector<32x128xf32>
    %40 = arith.addf %37, %39 : vector<32x128xf32>
    %cst_22 = arith.constant 0.000000e+00 : f32
    %41 = vector.broadcast %cst_22 : f32 to vector<32x128xf32>
    %42 = arith.maximumf %40, %41 : vector<32x128xf32>
    %c0_23 = arith.constant 0 : index
    %c160 = arith.constant 160 : index
    %43 = vector.load %arg2[%c0_23, %c160] : memref<32x224xbf16, #tpu.memory_space<vmem>>, vector<32x32xbf16>
    %44 = arith.truncf %42 : vector<32x128xf32> to vector<32x128xbf16>
    %cst_24 = arith.constant dense<0.000000e+00> : vector<32x128xf32>
    %45 = tpu.matmul %43, %44, %cst_24 {dimension_numbers = #tpu.dot_dimension_numbers<[1], [0], [0], [1], [0, 0, 1, 1], [], []>} : vector<32x32xbf16>, vector<32x128xbf16>, vector<32x128xf32> -> vector<32x128xf32>
    %c0_25 = arith.constant 0 : index
    %c5 = arith.constant 5 : index
    %46 = vector.load %arg3[%c0_25, %c5] : memref<32x7xf32, #tpu.memory_space<vmem>>, vector<32x1xf32>
    %47 = vector.broadcast %46 : vector<32x1xf32> to vector<32x128xf32>
    %48 = arith.addf %45, %47 : vector<32x128xf32>
    %cst_26 = arith.constant 0.000000e+00 : f32
    %49 = vector.broadcast %cst_26 : f32 to vector<32x128xf32>
    %50 = arith.maximumf %48, %49 : vector<32x128xf32>
    %c0_27 = arith.constant 0 : index
    %c192 = arith.constant 192 : index
    %51 = vector.load %arg2[%c0_27, %c192] : memref<32x224xbf16, #tpu.memory_space<vmem>>, vector<8x32xbf16>
    %52 = arith.truncf %50 : vector<32x128xf32> to vector<32x128xbf16>
    %cst_28 = arith.constant dense<0.000000e+00> : vector<8x128xf32>
    %53 = tpu.matmul %51, %52, %cst_28 {dimension_numbers = #tpu.dot_dimension_numbers<[1], [0], [0], [1], [0, 0, 1, 1], [], []>} : vector<8x32xbf16>, vector<32x128xbf16>, vector<8x128xf32> -> vector<8x128xf32>
    %c0_29 = arith.constant 0 : index
    %c6 = arith.constant 6 : index
    %54 = vector.load %arg3[%c0_29, %c6] : memref<32x7xf32, #tpu.memory_space<vmem>>, vector<8x1xf32>
    %55 = vector.broadcast %54 : vector<8x1xf32> to vector<8x128xf32>
    %56 = arith.addf %53, %55 : vector<8x128xf32>
    %c0_30 = arith.constant 0 : index
    %c0_31 = arith.constant 0 : index
    %57 = vector.load %arg4[%c0_30, %c0_31] : memref<8x128xf32, #tpu.memory_space<vmem>>, vector<8x128xf32>
    tpu.vector_store %arg4[%c0_30, %c0_31], %56 {strides = array<i32>} : memref<8x128xf32, #tpu.memory_space<vmem>>, vector<8x128xf32>,
    return
  }
  func.func @transform_0(%arg0: i32) -> (i32, i32) {
    %c0_i32 = arith.constant 0 : i32
    %c0_i32_0 = arith.constant 0 : i32
    return %arg0, %c0_i32 : i32, i32
  }
  func.func @transform_1(%arg0: i32) -> (i32, i32) {
    %c0_i32 = arith.constant 0 : i32
    %c0_i32_0 = arith.constant 0 : i32
    %c0_i32_1 = arith.constant 0 : i32
    return %c0_i32, %c0_i32_0 : i32, i32
  }
  func.func @transform_2(%arg0: i32) -> (i32, i32) {
    %c0_i32 = arith.constant 0 : i32
    %c0_i32_0 = arith.constant 0 : i32
    %c0_i32_1 = arith.constant 0 : i32
    return %c0_i32, %c0_i32_0 : i32, i32
  }
  func.func @transform_3(%arg0: i32) -> (i32, i32) {
    %c0_i32 = arith.constant 0 : i32
    %c0_i32_0 = arith.constant 0 : i32
    return %c0_i32, %arg0 : i32, i32
  }
}

</mosaic_0001>

<bundles_post_ra>
// kernel: tpu_custom_call.1
= control target key start
LH: loop header
LB: loop body
LE: loop exit
PB: predicated region body
PF: predicated region fallthrough
CT: control target
= control target key end

     0   :  { %vm40_vm0 = vcmask 39936   ;;  %vm96_vm1 = vcmask 261120   ;;  %v839_v5 = vmov 0   ;;  %s1039_s0 = inlined_call_operand.vmem [shape: f32[128,5], index: 0, kind: input, shape index: {}]   ;;  %s1040_s1 = inlined_call_operand.vmem [shape: bf16[32,224], index: 1, kind: input, shape index: {}]   ;;  %s1041_s2 = inlined_call_operand.vmem [shape: f32[32,7], index: 2, kind: input, shape index: {}]   ;;  %s1042_s3 = inlined_call_operand.hbm [shape: f32[8,128], index: 3, kind: output, shape index: {}]  }
   0x1   :  { %v30_v0 = vld [vmem:[%s1039_s0 + $0x70] sm:$0xff]  ;;  %v31_v1 = vld [vmem:[%s1039_s0 + $0x78] sm:$0xff]  ;;  %v28_v2 = vld [vmem:[%s1039_s0 + $0x60] sm:$0xff]  ;;  %799 = vset.pattern.permute.xlu0 %v839_v5  ;;  %800 = vset.pattern.permute.xlu1 %v839_v5 }
   0x2   :  { %v39_v3 = vpack.c.bf16 %v31_v1, %v30_v0  ;;  %v29_v4 = vld [vmem:[%s1039_s0 + $0x68] sm:$0xff]  ;;  %v26_v7 = vld [vmem:[%s1039_s0 + $0x50] sm:$0xff]  ;;  %v27_v8 = vld [vmem:[%s1039_s0 + $0x58] sm:$0xff] }
   0x3   :  { %v38_v6 = vpack.c.bf16 %v29_v4, %v28_v2  ;;  %v37_v12 = vpack.c.bf16 %v27_v8, %v26_v7  ;;  %v898_v13 = vld [vmem:[%s1040_s1] ss:$8 sps:$4 sm:$0xff]   ;;  %v905_v14 = vld [vmem:[%s1041_s2 + $0x10] sm:$0xff]  ;;  %v913_v17 = vld [vmem:[%s1041_s2 + $0x18] sm:$0xff] }
   0x4   :  { %v57_v9 = vsel %vm40_vm0, %v39_v3, 0  ;;  %726 = vmatprep.mubr.msk.bf16.mxu0 %vm96_vm1, %v898_v13  ;;  %78 = vperm.xlu0 %799, %v905_v14   ;;  %v918_v18 = vld [vmem:[%s1041_s2] sm:$0xff]  ;;  %v923_v19 = vld [vmem:[%s1041_s2 + $0x8] sm:$0xff] }
   0x5   :  { %778 = vmatprep.subr.msk.bf16.mxu0 %vm96_vm1, %v57_v9  ;;  %v117_v10 = vsel %vm96_vm1, %v57_v9, 0  ;;  %v55_v11 = vsel %vm40_vm0, %v38_v6, 0  ;;  %v53_v16 = vsel %vm40_vm0, %v37_v12, 0  ;;  %68 = vperm.xlu1 %800, %v918_v18  }
   0x6   :  { %711 = vmatpush3.bf16.xpose.msra.mxu0 %v117_v10  ;;  %v115_v15 = vsel %vm96_vm1, %v55_v11, 0 }
   0x7   :  { %779 = vmatprep.subr.msk.bf16.mxu0 %vm96_vm1, %v55_v11 }
   0x8   :  { %8 = vsyncpa [#allocation3], 0  ;;  %v24_v20 = vld [vmem:[%s1039_s0 + $0x40] sm:$0xff]  ;;  %v25_v21 = vld [vmem:[%s1039_s0 + $0x48] sm:$0xff]  ;;  %83 = vperm.xlu0 %799, %v913_v17   ;;  %s840_s12 = smov 96   ;;  %v113_v24 = vsel %vm96_vm1, %v53_v16, 0 }
   0x9   :  { %73 = vperm.xlu1 %800, %v923_v19   ;;  %v36_v22 = vpack.c.bf16 %v25_v21, %v24_v20  ;;  %v938_v23 = vld [vmem:[%s1040_s1 + $0x10] ss:$8 sps:$4 sm:$0xff]   ;;  %v20_v31 = vld [vmem:[%s1039_s0 + $0x20] sm:$0xff]  ;;  %v21_v32 = vld [vmem:[%s1039_s0 + $0x28] sm:$0xff]  ;;  %v841_v50 = vmov 1   ;;  %v843_v7 = vmov 2  }
   0xa   :  { %v22_v26 = vld [vmem:[%s1039_s0 + $0x30] sm:$0xff]  ;;  %v23_v27 = vld [vmem:[%s1039_s0 + $0x38] sm:$0xff]  ;;  %v34_v33 = vpack.c.bf16 %v21_v32, %v20_v31  ;;  %v16_v41 = vld [vmem:[%s1039_s0] sm:$0xff]  ;;  %s844_s29 = smov 32   ;;  %v845_v31 = vmov 3   ;;  %vm849_vm2 = vmmov 0  }
   0xb   :  { %v51_v25 = vsel %vm40_vm0, %v36_v22, 0  ;;  %v35_v28 = vpack.c.bf16 %v23_v27, %v22_v26  ;;  %v18_v36 = vld [vmem:[%s1039_s0 + $0x10] sm:$0xff]  ;;  %v19_v37 = vld [vmem:[%s1039_s0 + $0x18] sm:$0xff]  ;;  %v17_v42 = vld [vmem:[%s1039_s0 + $0x8] sm:$0xff]  ;;  %s842_s0 = smov 64  }
   0xc   :  { %190 = vrot.lane.b32.xlu0 %v898_v13, %s840_s12  ;;  %v111_v29 = vsel %vm96_vm1, %v51_v25, 0  ;;  %v47_v35 = vsel %vm40_vm0, %v34_v33, 0  ;;  %v33_v38 = vpack.c.bf16 %v19_v37, %v18_v36  ;;  %v32_v43 = vpack.c.bf16 %v17_v42, %v16_v41 }
   0xd   :  { %192 = vrot.lane.b32.xlu1 %v938_v23, %s840_s12  ;;  %v49_v30 = vsel %vm40_vm0, %v35_v28, 0  ;;  %v107_v39 = vsel %vm96_vm1, %v47_v35, 0  ;;  %801 = vset.pattern.permute.xlu0 %v841_v50 }
   0xe   :  { %713 = vmatpush3.bf16.xpose.msra.mxu0 %v115_v15  ;;  %v109_v34 = vsel %vm96_vm1, %v49_v30, 0  ;;  %v45_v40 = vsel %vm40_vm0, %v33_v38, 0  ;;  %v43_v45 = vsel %vm40_vm0, %v32_v43, 0  ;;  %802 = vset.pattern.permute.xlu1 %v841_v50  ;;  %v814_v50 = vld [vmem:[%s1040_s1 + $0x4] ss:$8 sps:$4 sm:$0xff]  }
   0xf   :  { %780 = vmatprep.subr.msk.bf16.mxu0 %vm96_vm1, %v53_v16  ;;  %v105_v44 = vsel %vm96_vm1, %v45_v40, 0  ;;  %v103_v46 = vsel %vm96_vm1, %v43_v45, 0 }
  0x10   :  { %183 = vperm.xlu0 %801, %v905_v14  }
  0x11   :  { %187 = vperm.xlu1 %802, %v913_v17  }
  0x14   :  { %179 = vperm.xlu0 %801, %v923_v19  }
  0x15   :  { %175 = vperm.xlu1 %802, %v918_v18  }
  0x16   :  { %715 = vmatpush3.bf16.xpose.msra.mxu0 %v113_v24 }
  0x17   :  { %781 = vmatprep.subr.msk.bf16.mxu0 %vm96_vm1, %v51_v25 }
  0x18   :  { %273 = vrot.lane.b32.xlu0 %v938_v23, %s842_s0 }
  0x19   :  { %271 = vrot.lane.b32.xlu1 %v898_v13, %s842_s0  ;;  %804 = vset.pattern.permute.xlu0 %v843_v7 }
  0x1a   :  { %803 = vset.pattern.permute.xlu1 %v843_v7 }
  0x1c   :  { %268 = vperm.xlu0 %804, %v913_v17  }
  0x1d   :  { %264 = vperm.xlu1 %803, %v905_v14  }
  0x1e   :  { %717 = vmatpush3.bf16.xpose.msra.mxu0 %v111_v29 }
  0x1f   :  { %782 = vmatprep.subr.msk.bf16.mxu0 %vm96_vm1, %v49_v30 }
  0x20   :  { %352 = vrot.lane.b32.xlu0 %v898_v13, %s844_s29 }
  0x21   :  { %256 = vperm.xlu1 %803, %v918_v18   ;;  %805 = vset.pattern.permute.xlu0 %v845_v31 }
  0x24   :  { %345 = vperm.xlu0 %805, %v905_v14  }
  0x25   :  { %260 = vperm.xlu1 %803, %v923_v19  }
  0x26   :  { %719 = vmatpush3.bf16.xpose.msra.mxu0 %v109_v34 }
  0x27   :  { %783 = vmatprep.subr.msk.bf16.mxu0 %vm96_vm1, %v47_v35 }
  0x28   :  { %341 = vperm.xlu0 %805, %v923_v19  }
  0x29   :  { %354 = vrot.lane.b32.xlu1 %v938_v23, %s844_s29 }
  0x2a   :  { %806 = vset.pattern.permute.xlu1 %v845_v31  ;;  %v850_v31 = vmov 6  }
  0x2d   :  { %349 = vperm.xlu1 %806, %v913_v17  }
  0x2e   :  { %721 = vmatpush3.bf16.xpose.msra.mxu0 %v107_v39 }
  0x2f   :  { %784 = vmatprep.subr.msk.bf16.mxu0 %vm96_vm1, %v45_v40 }
  0x31   :  { %337 = vperm.xlu1 %806, %v918_v18  }
  0x36   :  { %723 = vmatpush3.bf16.xpose.msra.mxu0 %v105_v44 }
  0x37   :  { %785 = vmatprep.subr.msk.bf16.mxu0 %vm96_vm1, %v43_v45 }
  0x3e   :  { %725 = vmatpush3.bf16.xpose.msra.mxu0 %v103_v46 }
  0x45   :  { %727 = vmatmul.mubr.msk.bf16.vlgmr.msra.gmra.mxu0 %vm96_vm1, %v938_v23 }
  0x7f   :  { %v79_v47 = vpop.permute.xlu0 %78 }
  0x80   :  { %v69_v51 = vpop.permute.xlu1 %68 }
  0x83   :  { %v84_v48 = vpop.permute.xlu0 %83 }
  0x84   :  { %v74_v58 = vpop.permute.xlu1 %73 }
  0x87   :  { %v191_v49 = vpop.permute.xlu0 %190 }
  0x88   :  { %734 = vmatprep.mubr.msk.bf16.mxu1 %vm96_vm1, %v191_v49  ;;  %v193_v3 = vpop.permute.xlu1 %192 }
  0x8b   :  { %v184_v8 = vpop.permute.xlu0 %183 }
  0x8c   :  { %v188_v4 = vpop.permute.xlu1 %187 }
  0x8f   :  { %v180_v20 = vpop.permute.xlu0 %179 }
  0x90   :  { %v176_v5 = vpop.permute.xlu1 %175 }
  0x93   :  { %v274_v23 = vpop.permute.xlu0 %273 }
  0x94   :  { %v272_v6 = vpop.permute.xlu1 %271 }
  0x97   :  { %v269_v29 = vpop.permute.xlu0 %268 }
  0x98   :  { %v265_v32 = vpop.permute.xlu1 %264 }
  0x9b   :  { %v353_v30 = vpop.permute.xlu0 %352 }
  0x9c   :  { %v257_v33 = vpop.permute.xlu1 %256 }
  0xa0   :  { %v261_v40 = vpop.permute.xlu1 %260 }
  0xa4   :  { %v355_v49 = vpop.permute.xlu1 %354 }
 0x105   :  { %v728_v52 = vpop.f32.mrf.mxu0 }
 0x106   :  { %v162_v54 = vadd.f32 %v728_v52, %v79_v47  ;;  %v815_v52 = vld [vmem:[%s1040_s1 + $0x14] ss:$8 sps:$4 sm:$0xff]  }
 0x107   :  { %v153_v53 = vpop.f32.mrf.mxu0 }
 0x108   :  { %v154_v56 = vadd.f32 %v153_v53, %v69_v51  ;;  %v170_v60 = vmax.f32 %v162_v54, 0.0  ;;  %v846_v51 = vmov 4   ;;  %v350_v53 = vpop.permute.xlu1 %349  ;;  %v346_v54 = vpop.permute.xlu0 %345 }
 0x109   :  { %v729_v55 = vpop.f32.mrf.mxu0  ;;  %807 = vset.pattern.permute.xlu1 %v846_v51  ;;  %808 = vset.pattern.permute.xlu0 %v846_v51 }
 0x10a   :  { %v165_v57 = vadd.f32 %v729_v55, %v84_v48  ;;  %v168_v63 = vmax.f32 %v154_v56, 0.0  ;;  %430 = vperm.xlu1 %807, %v905_v14   ;;  %434 = vperm.xlu0 %808, %v913_v17  }
 0x10b   :  { %v156_v59 = vpop.f32.mrf.mxu0 }
 0x10c   :  { %v171_v61 = vmax.f32 %v165_v57, 0.0  ;;  %v157_v62 = vadd.f32 %v156_v59, %v74_v58  ;;  %v338_v56 = vpop.permute.xlu1 %337 }
 0x10e   :  { %v169_v0 = vmax.f32 %v157_v62, 0.0  ;;  %v173_v1 = vpack.c.bf16 %v171_v61, %v170_v60  ;;  %422 = vperm.xlu1 %807, %v918_v18   ;;  %524 = vrot.lane.b32.xlu0 %v814_v50, %s840_s12  ;;  %v342_v62 = vpop.permute.xlu0 %341 }
 0x110   :  { %v172_v2 = vpack.c.bf16 %v169_v0, %v168_v63  ;;  %730 = vmatprep.subr.bf16.mxu1 %v173_v1 }
 0x111   :  { %731 = vmatpush3.bf16.msra.mxu1 %v173_v1 }
 0x112   :  { %732 = vmatprep.subr.bf16.mxu1 %v172_v2  ;;  %426 = vperm.xlu1 %807, %v923_v19  }
 0x115   :  { %733 = vmatpush3.bf16.msra.mxu1 %v172_v2 }
 0x116   :  { %526 = vrot.lane.b32.xlu1 %v815_v52, %s840_s12 }
 0x118   :  { %735 = vmatmul.mubr.msk.bf16.vlgmr.msra.gmra.mxu1 %vm96_vm1, %v193_v3 }
 0x119   :  { %742 = vmatprep.mubr.msk.bf16.mxu1 %vm96_vm1, %v272_v6 }
 0x185   :  { %v435_v7 = vpop.permute.xlu0 %434 }
 0x1d8   :  { %v736_v9 = vpop.f32.mrf.mxu1 }
 0x1d9   :  { %v243_v11 = vadd.f32 %v736_v9, %v184_v8  ;;  %v525_v8 = vpop.permute.xlu0 %524  ;;  %v847_v9 = vmov 5  }
 0x1da   :  { %v234_v10 = vpop.f32.mrf.mxu1  ;;  %810 = vset.pattern.permute.xlu1 %v847_v9  ;;  %809 = vset.pattern.permute.xlu0 %v847_v9 }
 0x1db   :  { %v235_v15 = vadd.f32 %v234_v10, %v176_v5  ;;  %v251_v22 = vmax.f32 %v243_v11, 0.0  ;;  %521 = vperm.xlu1 %810, %v913_v17   ;;  %517 = vperm.xlu0 %809, %v905_v14   ;;  %v816_v10 = vld [vmem:[%s1040_s1 + $0x4] ss:$0 sps:$4 sm:$0xff]   ;;  %v431_v11 = vpop.permute.xlu1 %430  ;;  %s851_s1 = smov [#allocation2]  }
 0x1dc   :  { %v737_v12 = vpop.f32.mrf.mxu1  ;;  %s651_s9 = sshll.u32 %s851_s1, 4  ;;  %s652_s9 = int_to_ptr.vmem [resolvable:$true] %s651_s9 }
 0x1dd   :  { %v246_v16 = vadd.f32 %v737_v12, %v188_v4  ;;  %v249_v26 = vmax.f32 %v235_v15, 0.0  ;;  %s817_s10 = scalar_lea.vmem %s652_s9, 128  ;;  %p822_p1 = scmp.lt.s32.totalorder %s652_s9, %s652_s9 }
 0x1de   :  { %v237_v21 = vpop.f32.mrf.mxu1  ;;  %p818_p0 = scmp.ne.s32.totalorder %s652_s9, %s817_s10  ;;  %p823_p2 = scmp.lt.s32.totalorder %s817_s10, %s817_s10 }
 0x1df   :  { %v252_v24 = vmax.f32 %v246_v16, 0.0  ;;  %v238_v25 = vadd.f32 %v237_v21, %v180_v20  ;;  %509 = vperm.xlu1 %810, %v918_v18   ;;  %513 = vperm.xlu0 %809, %v923_v19   ;;  %v423_v12 = vpop.permute.xlu1 %422 }
 0x1e0   :  { %p824_p3 = por %p823_p2, %p822_p1 }
 0x1e1   :  { %v254_v27 = vpack.c.bf16 %v252_v24, %v251_v22  ;;  %v250_v28 = vmax.f32 %v238_v25, 0.0 }
 0x1e2   :  { %p825_p4 = pnand %p824_p3, %p818_p0 }
 0x1e3   :  { %v253_v13 = vpack.c.bf16 %v250_v28, %v249_v26  ;;  %738 = vmatprep.subr.bf16.mxu1 %v254_v27  ;;  %599 = vrot.lane.b32.xlu1 %v816_v10, %s842_s0  ;;  %v427_v24 = vpop.permute.xlu1 %426 }
 0x1e4   :  { %739 = vmatpush3.bf16.msra.mxu1 %v254_v27  ;;  %811 = vset.pattern.permute.xlu0 %v850_v31 }
 0x1e5   :  { %740 = vmatprep.subr.bf16.mxu1 %v253_v13  ;;  %593 = vperm.xlu0 %811, %v918_v18  }
 0x1e8   :  { %741 = vmatpush3.bf16.msra.mxu1 %v253_v13 }
 0x1eb   :  { %743 = vmatmul.mubr.msk.bf16.vlgmr.msra.gmra.mxu1 %vm96_vm1, %v274_v23 }
 0x1ec   :  { %750 = vmatprep.mubr.msk.bf16.mxu1 %vm96_vm1, %v353_v30  ;;  %v848_v30 = vmov 0.0  }
 0x2ab   :  { %v744_v34 = vpop.f32.mrf.mxu1 }
 0x2ac   :  { %v324_v36 = vadd.f32 %v744_v34, %v265_v32 }
 0x2ad   :  { %v315_v35 = vpop.f32.mrf.mxu1 }
 0x2ae   :  { %v316_v38 = vadd.f32 %v315_v35, %v257_v33  ;;  %v332_v42 = vmax.f32 %v324_v36, 0.0  ;;  %v518_v33 = vpop.permute.xlu0 %517 }
 0x2af   :  { %v745_v37 = vpop.f32.mrf.mxu1 }
 0x2b0   :  { %v327_v39 = vadd.f32 %v745_v37, %v269_v29  ;;  %v330_v45 = vmax.f32 %v316_v38, 0.0  ;;  %v527_v29 = vpop.permute.xlu1 %526 }
 0x2b1   :  { %v318_v41 = vpop.f32.mrf.mxu1 }
 0x2b2   :  { %v333_v43 = vmax.f32 %v327_v39, 0.0  ;;  %v319_v44 = vadd.f32 %v318_v41, %v261_v40  ;;  %v514_v40 = vpop.permute.xlu0 %513 }
 0x2b4   :  { %v335_v46 = vpack.c.bf16 %v333_v43, %v332_v42  ;;  %v331_v47 = vmax.f32 %v319_v44, 0.0  ;;  %v522_v32 = vpop.permute.xlu1 %521 }
 0x2b6   :  { %v334_v48 = vpack.c.bf16 %v331_v47, %v330_v45  ;;  %746 = vmatprep.subr.bf16.mxu1 %v335_v46 }
 0x2b7   :  { %747 = vmatpush3.bf16.msra.mxu1 %v335_v46 }
 0x2b8   :  { %748 = vmatprep.subr.bf16.mxu1 %v334_v48  ;;  %v510_v37 = vpop.permute.xlu1 %509 }
 0x2bb   :  { %749 = vmatpush3.bf16.msra.mxu1 %v334_v48 }
 0x2be   :  { %751 = vmatmul.mubr.msk.bf16.vlgmr.msra.gmra.mxu1 %vm96_vm1, %v355_v49  ;;  %v600_v49 = vpop.permute.xlu1 %599 }
 0x2bf   :  { %758 = vmatprep.mubr.msk.bf16.mxu1 %vm96_vm1, %v814_v50  ;;  %v594_v50 = vpop.permute.xlu0 %593 }
 0x37e   :  { %v752_v55 = vpop.f32.mrf.mxu1 }
 0x37f   :  { %v405_v58 = vadd.f32 %v752_v55, %v346_v54 }
 0x380   :  { %v396_v57 = vpop.f32.mrf.mxu1 }
 0x381   :  { %v397_v60 = vadd.f32 %v396_v57, %v338_v56  ;;  %v413_v0 = vmax.f32 %v405_v58, 0.0 }
 0x382   :  { %v753_v59 = vpop.f32.mrf.mxu1 }
 0x383   :  { %v408_v61 = vadd.f32 %v753_v59, %v350_v53  ;;  %v411_v3 = vmax.f32 %v397_v60, 0.0 }
 0x384   :  { %v399_v63 = vpop.f32.mrf.mxu1 }
 0x385   :  { %v414_v1 = vmax.f32 %v408_v61, 0.0  ;;  %v400_v2 = vadd.f32 %v399_v63, %v342_v62 }
 0x387   :  { %v420_v4 = vpack.c.bf16 %v414_v1, %v413_v0  ;;  %v412_v5 = vmax.f32 %v400_v2, 0.0 }
 0x389   :  { %v419_v6 = vpack.c.bf16 %v412_v5, %v411_v3  ;;  %754 = vmatprep.subr.bf16.mxu1 %v420_v4 }
 0x38a   :  { %755 = vmatpush3.bf16.msra.mxu1 %v420_v4 }
 0x38b   :  { %756 = vmatprep.subr.bf16.mxu1 %v419_v6 }
 0x38e   :  { %757 = vmatpush3.bf16.msra.mxu1 %v419_v6 }
 0x391   :  { %759 = vmatmul.mubr.msk.bf16.vlgmr.msra.gmra.mxu1 %vm96_vm1, %v815_v52 }
 0x392   :  { %766 = vmatprep.mubr.msk.bf16.mxu1 %vm96_vm1, %v525_v8 }
 0x451   :  { %v760_v15 = vpop.f32.mrf.mxu1 }
 0x452   :  { %v496_v20 = vadd.f32 %v760_v15, %v431_v11 }
 0x453   :  { %v487_v16 = vpop.f32.mrf.mxu1 }
 0x454   :  { %v488_v22 = vadd.f32 %v487_v16, %v423_v12  ;;  %v504_v25 = vmax.f32 %v496_v20, 0.0 }
 0x455   :  { %v761_v21 = vpop.f32.mrf.mxu1 }
 0x456   :  { %v499_v17 = vadd.f32 %v761_v21, %v435_v7  ;;  %v502_v19 = vmax.f32 %v488_v22, 0.0 }
 0x457   :  { %v490_v14 = vpop.f32.mrf.mxu1 }
 0x458   :  { %v505_v26 = vmax.f32 %v499_v17, 0.0  ;;  %v491_v27 = vadd.f32 %v490_v14, %v427_v24 }
 0x45a   :  { %v507_v28 = vpack.c.bf16 %v505_v26, %v504_v25  ;;  %v503_v13 = vmax.f32 %v491_v27, 0.0 }
 0x45c   :  { %v506_v23 = vpack.c.bf16 %v503_v13, %v502_v19  ;;  %762 = vmatprep.subr.bf16.mxu1 %v507_v28 }
 0x45d   :  { %763 = vmatpush3.bf16.msra.mxu1 %v507_v28 }
 0x45e   :  { %764 = vmatprep.subr.bf16.mxu1 %v506_v23 }
 0x461   :  { %765 = vmatpush3.bf16.msra.mxu1 %v506_v23 }
 0x462   :  { %770 = vmatprep.subr.bf16.mxu1 %v848_v30 }
 0x464   :  { %767 = vmatmul.mubr.msk.bf16.vlgmr.msra.gmra.mxu1 %vm96_vm1, %v527_v29 }
 0x465   :  { %774 = vmatprep.mubr.msk.bf16.mxu1 %vm849_vm2, %v848_v30 }
 0x524   :  { %v768_v34 = vpop.f32.mrf.mxu1 }
 0x525   :  { %v577_v36 = vadd.f32 %v768_v34, %v518_v33 }
 0x526   :  { %v568_v35 = vpop.f32.mrf.mxu1 }
 0x527   :  { %v585_v42 = vmax.f32 %v577_v36, 0.0  ;;  %v569_v43 = vadd.f32 %v568_v35, %v510_v37 }
 0x528   :  { %v769_v38 = vpop.f32.mrf.mxu1 }
 0x529   :  { %v580_v39 = vadd.f32 %v769_v38, %v522_v32  ;;  %v583_v48 = vmax.f32 %v569_v43, 0.0 }
 0x52a   :  { %v571_v41 = vpop.f32.mrf.mxu1 }
 0x52b   :  { %v586_v44 = vmax.f32 %v580_v39, 0.0  ;;  %v572_v45 = vadd.f32 %v571_v41, %v514_v40 }
 0x52d   :  { %v589_v46 = vpack.c.bf16 %v586_v44, %v585_v42  ;;  %v584_v47 = vmax.f32 %v572_v45, 0.0 }
 0x52f   :  { %771 = vmatpush3.bf16.msra.mxu1 %v589_v46  ;;  %v588_v18 = vpack.c.bf16 %v584_v47, %v583_v48 }
 0x530   :  { %772 = vmatprep.subr.bf16.mxu1 %v848_v30 }
 0x533   :  { %773 = vmatpush3.bf16.msra.mxu1 %v588_v18 }
 0x536   :  { %775 = vmatmul.mubr.msk.bf16.vlgmr.msra.gmra.mxu1 %vm96_vm1, %v600_v49 }
 0x5f6   :  { %v638_v51 = vpop.f32.mrf.mxu1 }
 0x5f7   :  { %v639_v52 = vadd.f32 %v638_v51, %v594_v50 }
 0x5f8   :  { %v776_v53 = vpop.f32.mrf.mxu1 }
 0x5f9   :  { %644 = vst [vmem:[#allocation2] sm:$0xff] %v639_v52 }
 0x5fa   :  { %v641_v54 = vpop.f32.mrf.mxu1 }
 0x5fb   :  { %828 = shalt.err (!%p825_p4)
}
 0x5fc   :  { %654 = dma.vmem_to_hbm [thread:$0]  %s652_s9, 128, %s1042_s3, [#allocation3]   ;;  %v777_v55 = vpop.f32.mrf.mxu1 }
 0x5fd   :  { %837 = dma.done.wait [#allocation3], 128  }
 0x5fe   :  { %838 = vsyncadd [#allocation3], 4294967168 }
 0x5ff   :  { %658 = vsyncpa [#allocation3], 1 }

</bundles_post_ra>
